<compile_context>
chip_gen: v7x
topology: tpu7x:2x2x1
jax: 0.10.0
libtpu: 0.0.40
codegen_flags: <defaults>
</compile_context>

<pallas_src>
import functools

import jax
import jax.numpy as jnp
from jax.experimental import pallas as pl
from jax.experimental.pallas import tpu as pltpu

KERNEL = 4
STRIDE = 2
PAD = 1
EPS = 1e-5          # nn.BatchNorm2d default eps
NEG_SLOPE = 0.2     # nn.LeakyReLU(0.2)


def _vmem_limit_bytes():
    """Generation-aware scoped-VMEM budget (~3/4 of physical VMEM)."""
    cap = 64 * 1024 * 1024                      # safe fallback (v7x-sized)
    try:
        info = pltpu.get_tpu_info()
        cap = int(getattr(info, "vmem_capacity_bytes", cap)) or cap
    except Exception:
        pass
    return (cap * 3) // 4


def _make_conv_kernel(ho, wo, add_bias, act_inline, compute_stats):
    """Pass 1 (one batch image per grid step): fused-im2col conv.

    Inputs: H-even / H-odd phase slabs of the W-direction im2col, each
    (Ho+1, Wo, 4*Cin) bf16, plus per-ki weight taps (4, 4*Cin, Cout) bf16.
    The 4x4/stride-2 conv becomes 4 MXU matmuls accumulated in f32.
    Optionally fuses bias + LeakyReLU (no-BN path) and per-image BN partial
    stats.  The result is stored transposed as (Cout, Ho*Wo) so the final
    NCHW layout is a free reshape and the store is lane-dense.
    """
    mi = ho * wo

    def kernel(*refs):
        if add_bias:
            xe_ref, xo_ref, w_ref, b_ref = refs[:4]
            out_refs = refs[4:]
        else:
            xe_ref, xo_ref, w_ref = refs[:3]
            out_refs = refs[3:]

        xe = xe_ref[...]                     # (Ho+1, Wo, 4*Cin) bf16
        xo = xo_ref[...]
        kc = xe.shape[-1]

        # ki = 0..3  ->  (row phase, row offset): (e,0), (o,0), (e,1), (o,1)
        acc = jnp.dot(xe[:ho].reshape(mi, kc), w_ref[0],
                      preferred_element_type=jnp.float32)
        acc += jnp.dot(xo[:ho].reshape(mi, kc), w_ref[1],
                       preferred_element_type=jnp.float32)
        acc += jnp.dot(xe[1:].reshape(mi, kc), w_ref[2],
                       preferred_element_type=jnp.float32)
        acc += jnp.dot(xo[1:].reshape(mi, kc), w_ref[3],
                       preferred_element_type=jnp.float32)

        if add_bias:
            acc = acc + b_ref[...]                       # (1, Cout) broadcast

        if compute_stats:
            y_ref, sum_ref, sq_ref = out_refs
            # Partial BN stats from the f32 accumulator (before any bf16 cast).
            # One-pass E[y^2]-E[y]^2 in f32; OK for activation-scale data.
            sum_ref[...] = jnp.sum(acc, axis=0, keepdims=True)
            sq_ref[...] = jnp.sum(acc * acc, axis=0, keepdims=True)
        else:
            (y_ref,) = out_refs

        if act_inline:
            acc = jnp.maximum(acc, NEG_SLOPE * acc)      # LeakyReLU(0.2)

        # (Ho*Wo, Cout) -> (Cout, Ho*Wo): NCHW for free, lane-dense store.
        y_ref[...] = jnp.transpose(acc).astype(y_ref.dtype)

    return kernel


def _make_bn_act_kernel(activation):
    """Pass 2: folded BN affine (per-channel scale/shift) + LeakyReLU."""
    def kernel(y_ref, scale_ref, shift_ref, o_ref):
        y = y_ref[...].astype(jnp.float32)               # (Cout, Ho*Wo)
        z = y * scale_ref[...] + shift_ref[...]          # (Cout, 1) broadcast
        if activation:
            z = jnp.maximum(z, NEG_SLOPE * z)
        o_ref[...] = z
    return kernel


@functools.partial(jax.jit, static_argnames=("activation", "batchnorm"))
def downsample_conv(x_nchw, w_oihw, bias, gamma, beta,
                    activation=True, batchnorm=True):
    n, cin, h, w = x_nchw.shape
    cout = w_oihw.shape[0]
    assert h % 2 == 0 and w % 2 == 0, "even spatial dims expected (PatchGAN)"
    ho, wo = h // 2, w // 2
    hq = ho + 1                      # rows per H phase slab
    kc = KERNEL * cin                # W-direction im2col channel depth
    mi = ho * wo
    vmem = _vmem_limit_bytes()

    # ---- XLA glue, all in bf16 (halves pre-kernel HBM traffic) ----
    # NCHW -> NHWC, zero-pad spatial, W-direction stride-2 gather (4 taps
    # folded into channels), split H rows into even/odd phases so the 4
    # remaining H-taps are contiguous row windows inside the kernel.
    xh = jnp.transpose(x_nchw, (0, 2, 3, 1)).astype(jnp.bfloat16)
    xp = jnp.pad(xh, ((0, 0), (PAD, PAD), (PAD, PAD), (0, 0)))     # (N,H+2,W+2,Cin)
    cols = [xp[:, :, kj:kj + 2 * wo:2, :] for kj in range(KERNEL)]  # 4x (N,H+2,Wo,Cin)
    xw = jnp.stack(cols, axis=3).reshape(n, h + 2, wo, kc)          # (N,H+2,Wo,4Cin)
    xe = xw[:, 0::2]                                                # (N,Ho+1,Wo,4Cin)
    xo = xw[:, 1::2]                                                # (N,Ho+1,Wo,4Cin)

    # Weight taps: (Cout,Cin,Kh,Kw) -> (Kh, Kw*Cin, Cout); kj-major matches xw.
    w_taps = jnp.transpose(w_oihw, (2, 3, 1, 0)).reshape(KERNEL, kc, cout)
    w_taps = w_taps.astype(jnp.bfloat16)

    add_bias = not batchnorm            # BN cancels a per-channel conv bias
    act_inline = activation and not batchnorm
    y_dtype = jnp.bfloat16 if batchnorm else jnp.float32   # bf16 intermediate

    in_specs = [
        pl.BlockSpec((None, hq, wo, kc), lambda i: (i, 0, 0, 0)),
        pl.BlockSpec((None, hq, wo, kc), lambda i: (i, 0, 0, 0)),
        # Constant index map: the resident weight block is reused across steps.
        pl.BlockSpec((KERNEL, kc, cout), lambda i: (0, 0, 0)),
    ]
    operands = [xe, xo, w_taps]
    if add_bias:
        in_specs.append(pl.BlockSpec((1, cout), lambda i: (0, 0)))
        operands.append(bias.astype(jnp.float32).reshape(1, cout))

    y_spec = pl.BlockSpec((None, cout, mi), lambda i: (i, 0, 0))
    if batchnorm:
        out_shape = (
            jax.ShapeDtypeStruct((n, cout, mi), y_dtype),
            jax.ShapeDtypeStruct((n, 1, cout), jnp.float32),
            jax.ShapeDtypeStruct((n, 1, cout), jnp.float32),
        )
        out_specs = (
            y_spec,
            pl.BlockSpec((None, 1, cout), lambda i: (i, 0, 0)),
            pl.BlockSpec((None, 1, cout), lambda i: (i, 0, 0)),
        )
    else:
        out_shape = jax.ShapeDtypeStruct((n, cout, mi), y_dtype)
        out_specs = y_spec

    conv_out = pl.pallas_call(
        _make_conv_kernel(ho, wo, add_bias, act_inline, batchnorm),
        out_shape=out_shape,
        grid=(n,),
        in_specs=in_specs,
        out_specs=out_specs,
        compiler_params=pltpu.CompilerParams(
            dimension_semantics=("parallel",),
            vmem_limit_bytes=vmem),
    )(*operands)

    if batchnorm:
        y, psum, psq = conv_out
        # Finalize stats (tiny XLA): training-mode batch statistics, matching
        # the reference (not PyTorch eval-mode running stats).
        m = n * mi
        total_sum = jnp.sum(psum[:, 0, :], axis=0)
        total_sq = jnp.sum(psq[:, 0, :], axis=0)
        mean = total_sum / m
        var = jnp.maximum(total_sq / m - mean * mean, 0.0)
        scale = gamma.astype(jnp.float32) * jax.lax.rsqrt(var + EPS)
        shift = beta.astype(jnp.float32) - mean * scale

        out_flat = pl.pallas_call(
            _make_bn_act_kernel(activation),
            out_shape=jax.ShapeDtypeStruct((n, cout, mi), jnp.float32),
            grid=(n,),
            in_specs=[
                pl.BlockSpec((None, cout, mi), lambda i: (i, 0, 0)),
                pl.BlockSpec((cout, 1), lambda i: (0, 0)),
                pl.BlockSpec((cout, 1), lambda i: (0, 0)),
            ],
            out_specs=pl.BlockSpec((None, cout, mi), lambda i: (i, 0, 0)),
            compiler_params=pltpu.CompilerParams(
                dimension_semantics=("parallel",),
                vmem_limit_bytes=vmem),
        )(y, scale.reshape(cout, 1), shift.reshape(cout, 1))
    else:
        out_flat = conv_out

    # (N, Cout, Ho*Wo) -> (N, Cout, Ho, Wo): pure-metadata reshape (no copy).
    return out_flat.reshape(n, cout, ho, wo)


def _reference(x_nchw, w_oihw, bias, gamma, beta, activation=True, batchnorm=True):
    """Pure-JAX reference matching PyTorch semantics (training-mode BN)."""
    y = jax.lax.conv_general_dilated(
        x_nchw.astype(jnp.float32), w_oihw.astype(jnp.float32),
        window_strides=(STRIDE, STRIDE),
        padding=((PAD, PAD), (PAD, PAD)),
        dimension_numbers=("NCHW", "OIHW", "NCHW"))
    y = y + bias.reshape(1, -1, 1, 1)
    if batchnorm:
        mean = jnp.mean(y, axis=(0, 2, 3), keepdims=True)
        var = jnp.mean((y - mean) ** 2, axis=(0, 2, 3), keepdims=True)
        y = (y - mean) * jax.lax.rsqrt(var + EPS)
        y = y * gamma.reshape(1, -1, 1, 1) + beta.reshape(1, -1, 1, 1)
    if activation:
        y = jnp.where(y > 0, y, NEG_SLOPE * y)
    return y


if __name__ == "__main__":
    key = jax.random.PRNGKey(0)
    k_x, k_w, k_b = jax.random.split(key, 3)

    N, C_IN, C_OUT, H, W = 2, 4, 8, 16, 16

    x = jax.random.normal(k_x, (N, C_IN, H, W), dtype=jnp.float32)
    w = jax.random.normal(k_w, (C_OUT, C_IN, KERNEL, KERNEL), dtype=jnp.float32) * 0.1
    b = jax.random.normal(k_b, (C_OUT,), dtype=jnp.float32) * 0.1
    gamma = jnp.ones((C_OUT,), dtype=jnp.float32)   # BatchNorm2d default init
    beta = jnp.zeros((C_OUT,), dtype=jnp.float32)

    # Default block: conv -> BatchNorm -> LeakyReLU(0.2)
    out = jax.block_until_ready(downsample_conv(x, w, b, gamma, beta))
    ref = _reference(x, w, b, gamma, beta)
    assert out.shape == (N, C_OUT, H // 2, W // 2), out.shape
    # bf16 matmul inputs + bf16 intermediate y (f32 accumulation / BN math):
    # bf16-level tolerance vs the f32 reference.
    assert jnp.allclose(out, ref, rtol=3e-2, atol=3e-2), "mismatch vs reference (bn)"

    # First-PatchGAN-block variant: conv(+bias) -> LeakyReLU (no BN)
    out2 = jax.block_until_ready(
        downsample_conv(x, w, b, gamma, beta, activation=True, batchnorm=False))
    ref2 = _reference(x, w, b, gamma, beta, activation=True, batchnorm=False)
    assert jnp.allclose(out2, ref2, rtol=3e-2, atol=3e-2), "mismatch vs reference (no bn)"

    print("KERNEL_OK")
</pallas_src>

<mosaic_0001>
module attributes {stable_mosaic.version = 11 : i64} {
  func.func @kernel(%arg0: i32, %arg1: memref<1x9x8x16xbf16, #tpu.memory_space<vmem>>, %arg2: memref<1x9x8x16xbf16, #tpu.memory_space<vmem>>, %arg3: memref<4x16x8xbf16, #tpu.memory_space<vmem>>, %arg4: memref<1x8x64xbf16, #tpu.memory_space<vmem>>, %arg5: memref<1x1x8xf32, #tpu.memory_space<vmem>>, %arg6: memref<1x1x8xf32, #tpu.memory_space<vmem>>) attributes {dimension_semantics = [#tpu.dimension_semantics<parallel>], iteration_bounds = array<i64: 2>, scalar_prefetch = 0 : i64, scratch_operands = 0 : i64, tpu.core_type = #tpu.core_type<tc>, window_params = [{transform_indices = @transform_0, window_bounds = array<i64: 1, 9, 8, 16>}, {transform_indices = @transform_1, window_bounds = array<i64: 1, 9, 8, 16>}, {pipeline_mode = #tpu.pipeline_mode<synchronous>, transform_indices = @transform_2, window_bounds = array<i64: 4, 16, 8>}, {transform_indices = @transform_3, window_bounds = array<i64: 1, 8, 64>}, {transform_indices = @transform_4, window_bounds = array<i64: 1, 1, 8>}, {transform_indices = @transform_5, window_bounds = array<i64: 1, 1, 8>}]} {
    %c0 = arith.constant 0 : index
    %c0_0 = arith.constant 0 : index
    %c0_1 = arith.constant 0 : index
    %c0_2 = arith.constant 0 : index
    %0 = vector.load %arg1[%c0, %c0_0, %c0_1, %c0_2] : memref<1x9x8x16xbf16, #tpu.memory_space<vmem>>, vector<1x9x8x16xbf16>
    %1 = vector.shape_cast %0 : vector<1x9x8x16xbf16> to vector<9x8x16xbf16>
    %c0_3 = arith.constant 0 : index
    %c0_4 = arith.constant 0 : index
    %c0_5 = arith.constant 0 : index
    %c0_6 = arith.constant 0 : index
    %2 = vector.load %arg2[%c0_3, %c0_4, %c0_5, %c0_6] : memref<1x9x8x16xbf16, #tpu.memory_space<vmem>>, vector<1x9x8x16xbf16>
    %3 = vector.shape_cast %2 : vector<1x9x8x16xbf16> to vector<9x8x16xbf16>
    %4 = vector.extract_strided_slice %1 {offsets = [0, 0, 0], sizes = [8, 8, 16], strides = [1, 1, 1]} : vector<9x8x16xbf16> to vector<8x8x16xbf16>
    %5 = vector.shape_cast %4 : vector<8x8x16xbf16> to vector<64x16xbf16>
    %c0_7 = arith.constant 0 : index
    %c0_8 = arith.constant 0 : index
    %c0_9 = arith.constant 0 : index
    %6 = vector.load %arg3[%c0_7, %c0_8, %c0_9] : memref<4x16x8xbf16, #tpu.memory_space<vmem>>, vector<1x16x8xbf16>
    %7 = vector.shape_cast %6 : vector<1x16x8xbf16> to vector<16x8xbf16>
    %cst = arith.constant dense<0.000000e+00> : vector<64x8xf32>
    %8 = tpu.matmul %5, %7, %cst {dimension_numbers = #tpu.dot_dimension_numbers<[1], [0], [0], [1], [0, 0, 1, 1], [], []>} : vector<64x16xbf16>, vector<16x8xbf16>, vector<64x8xf32> -> vector<64x8xf32>
    %9 = vector.extract_strided_slice %3 {offsets = [0, 0, 0], sizes = [8, 8, 16], strides = [1, 1, 1]} : vector<9x8x16xbf16> to vector<8x8x16xbf16>
    %10 = vector.shape_cast %9 : vector<8x8x16xbf16> to vector<64x16xbf16>
    %c1 = arith.constant 1 : index
    %c0_10 = arith.constant 0 : index
    %c0_11 = arith.constant 0 : index
    %11 = vector.load %arg3[%c1, %c0_10, %c0_11] : memref<4x16x8xbf16, #tpu.memory_space<vmem>>, vector<1x16x8xbf16>
    %12 = vector.shape_cast %11 : vector<1x16x8xbf16> to vector<16x8xbf16>
    %cst_12 = arith.constant dense<0.000000e+00> : vector<64x8xf32>
    %13 = tpu.matmul %10, %12, %cst_12 {dimension_numbers = #tpu.dot_dimension_numbers<[1], [0], [0], [1], [0, 0, 1, 1], [], []>} : vector<64x16xbf16>, vector<16x8xbf16>, vector<64x8xf32> -> vector<64x8xf32>
    %14 = arith.addf %8, %13 : vector<64x8xf32>
    %15 = vector.extract_strided_slice %1 {offsets = [1, 0, 0], sizes = [8, 8, 16], strides = [1, 1, 1]} : vector<9x8x16xbf16> to vector<8x8x16xbf16>
    %16 = vector.shape_cast %15 : vector<8x8x16xbf16> to vector<64x16xbf16>
    %c2 = arith.constant 2 : index
    %c0_13 = arith.constant 0 : index
    %c0_14 = arith.constant 0 : index
    %17 = vector.load %arg3[%c2, %c0_13, %c0_14] : memref<4x16x8xbf16, #tpu.memory_space<vmem>>, vector<1x16x8xbf16>
    %18 = vector.shape_cast %17 : vector<1x16x8xbf16> to vector<16x8xbf16>
    %cst_15 = arith.constant dense<0.000000e+00> : vector<64x8xf32>
    %19 = tpu.matmul %16, %18, %cst_15 {dimension_numbers = #tpu.dot_dimension_numbers<[1], [0], [0], [1], [0, 0, 1, 1], [], []>} : vector<64x16xbf16>, vector<16x8xbf16>, vector<64x8xf32> -> vector<64x8xf32>
    %20 = arith.addf %14, %19 : vector<64x8xf32>
    %21 = vector.extract_strided_slice %3 {offsets = [1, 0, 0], sizes = [8, 8, 16], strides = [1, 1, 1]} : vector<9x8x16xbf16> to vector<8x8x16xbf16>
    %22 = vector.shape_cast %21 : vector<8x8x16xbf16> to vector<64x16xbf16>
    %c3 = arith.constant 3 : index
    %c0_16 = arith.constant 0 : index
    %c0_17 = arith.constant 0 : index
    %23 = vector.load %arg3[%c3, %c0_16, %c0_17] : memref<4x16x8xbf16, #tpu.memory_space<vmem>>, vector<1x16x8xbf16>
    %24 = vector.shape_cast %23 : vector<1x16x8xbf16> to vector<16x8xbf16>
    %cst_18 = arith.constant dense<0.000000e+00> : vector<64x8xf32>
    %25 = tpu.matmul %22, %24, %cst_18 {dimension_numbers = #tpu.dot_dimension_numbers<[1], [0], [0], [1], [0, 0, 1, 1], [], []>} : vector<64x16xbf16>, vector<16x8xbf16>, vector<64x8xf32> -> vector<64x8xf32>
    %26 = arith.addf %20, %25 : vector<64x8xf32>
    %cst_19 = arith.constant dense<0.000000e+00> : vector<8xf32>
    %27 = vector.multi_reduction <add>, %26, %cst_19 [0] : vector<64x8xf32> to vector<8xf32>
    %28 = vector.shape_cast %27 : vector<8xf32> to vector<1x8xf32>
    %c0_20 = arith.constant 0 : index
    %c0_21 = arith.constant 0 : index
    %c0_22 = arith.constant 0 : index
    %29 = vector.load %arg5[%c0_20, %c0_21, %c0_22] : memref<1x1x8xf32, #tpu.memory_space<vmem>>, vector<1x1x8xf32>
    %30 = vector.shape_cast %29 : vector<1x1x8xf32> to vector<1x8xf32>
    %31 = vector.shape_cast %28 : vector<1x8xf32> to vector<1x1x8xf32>
    tpu.vector_store %arg5[%c0_20, %c0_21, %c0_22], %31 {strides = array<i32>} : memref<1x1x8xf32, #tpu.memory_space<vmem>>, vector<1x1x8xf32>,
    %32 = arith.mulf %26, %26 : vector<64x8xf32>
    %cst_23 = arith.constant dense<0.000000e+00> : vector<8xf32>
    %33 = vector.multi_reduction <add>, %32, %cst_23 [0] : vector<64x8xf32> to vector<8xf32>
    %34 = vector.shape_cast %33 : vector<8xf32> to vector<1x8xf32>
    %c0_24 = arith.constant 0 : index
    %c0_25 = arith.constant 0 : index
    %c0_26 = arith.constant 0 : index
    %35 = vector.load %arg6[%c0_24, %c0_25, %c0_26] : memref<1x1x8xf32, #tpu.memory_space<vmem>>, vector<1x1x8xf32>
    %36 = vector.shape_cast %35 : vector<1x1x8xf32> to vector<1x8xf32>
    %37 = vector.shape_cast %34 : vector<1x8xf32> to vector<1x1x8xf32>
    tpu.vector_store %arg6[%c0_24, %c0_25, %c0_26], %37 {strides = array<i32>} : memref<1x1x8xf32, #tpu.memory_space<vmem>>, vector<1x1x8xf32>,
    %38 = tpu.transpose %26, [1, 0] : vector<64x8xf32> -> vector<8x64xf32>
    %39 = arith.truncf %38 : vector<8x64xf32> to vector<8x64xbf16>
    %c0_27 = arith.constant 0 : index
    %c0_28 = arith.constant 0 : index
    %c0_29 = arith.constant 0 : index
    %40 = vector.load %arg4[%c0_27, %c0_28, %c0_29] : memref<1x8x64xbf16, #tpu.memory_space<vmem>>, vector<1x8x64xbf16>
    %41 = vector.shape_cast %40 : vector<1x8x64xbf16> to vector<8x64xbf16>
    %42 = vector.shape_cast %39 : vector<8x64xbf16> to vector<1x8x64xbf16>
    tpu.vector_store %arg4[%c0_27, %c0_28, %c0_29], %42 {strides = array<i32>} : memref<1x8x64xbf16, #tpu.memory_space<vmem>>, vector<1x8x64xbf16>,
    return
  }
  func.func @transform_0(%arg0: i32) -> (i32, i32, i32, i32) {
    %c0_i32 = arith.constant 0 : i32
    %c0_i32_0 = arith.constant 0 : i32
    %c0_i32_1 = arith.constant 0 : i32
    %c0_i32_2 = arith.constant 0 : i32
    return %arg0, %c0_i32, %c0_i32_0, %c0_i32_1 : i32, i32, i32, i32
  }
  func.func @transform_1(%arg0: i32) -> (i32, i32, i32, i32) {
    %c0_i32 = arith.constant 0 : i32
    %c0_i32_0 = arith.constant 0 : i32
    %c0_i32_1 = arith.constant 0 : i32
    %c0_i32_2 = arith.constant 0 : i32
    return %arg0, %c0_i32, %c0_i32_0, %c0_i32_1 : i32, i32, i32, i32
  }
  func.func @transform_2(%arg0: i32) -> (i32, i32, i32) {
    %c0_i32 = arith.constant 0 : i32
    %c0_i32_0 = arith.constant 0 : i32
    %c0_i32_1 = arith.constant 0 : i32
    %c0_i32_2 = arith.constant 0 : i32
    return %c0_i32, %c0_i32_0, %c0_i32_1 : i32, i32, i32
  }
  func.func @transform_3(%arg0: i32) -> (i32, i32, i32) {
    %c0_i32 = arith.constant 0 : i32
    %c0_i32_0 = arith.constant 0 : i32
    %c0_i32_1 = arith.constant 0 : i32
    return %arg0, %c0_i32, %c0_i32_0 : i32, i32, i32
  }
  func.func @transform_4(%arg0: i32) -> (i32, i32, i32) {
    %c0_i32 = arith.constant 0 : i32
    %c0_i32_0 = arith.constant 0 : i32
    %c0_i32_1 = arith.constant 0 : i32
    return %arg0, %c0_i32, %c0_i32_0 : i32, i32, i32
  }
  func.func @transform_5(%arg0: i32) -> (i32, i32, i32) {
    %c0_i32 = arith.constant 0 : i32
    %c0_i32_0 = arith.constant 0 : i32
    %c0_i32_1 = arith.constant 0 : i32
    return %arg0, %c0_i32, %c0_i32_0 : i32, i32, i32
  }
}

module attributes {stable_mosaic.version = 11 : i64} {
  func.func @kernel(%arg0: i32, %arg1: memref<1x8x64xbf16, #tpu.memory_space<vmem>>, %arg2: memref<8x1xf32, #tpu.memory_space<vmem>>, %arg3: memref<8x1xf32, #tpu.memory_space<vmem>>, %arg4: memref<1x8x64xf32, #tpu.memory_space<vmem>>) attributes {dimension_semantics = [#tpu.dimension_semantics<parallel>], iteration_bounds = array<i64: 2>, scalar_prefetch = 0 : i64, scratch_operands = 0 : i64, tpu.core_type = #tpu.core_type<tc>, window_params = [{transform_indices = @transform_0, window_bounds = array<i64: 1, 8, 64>}, {pipeline_mode = #tpu.pipeline_mode<synchronous>, transform_indices = @transform_1, window_bounds = array<i64: 8, 1>}, {pipeline_mode = #tpu.pipeline_mode<synchronous>, transform_indices = @transform_2, window_bounds = array<i64: 8, 1>}, {transform_indices = @transform_3, window_bounds = array<i64: 1, 8, 64>}]} {
    %c0 = arith.constant 0 : index
    %c0_0 = arith.constant 0 : index
    %c0_1 = arith.constant 0 : index
    %0 = vector.load %arg1[%c0, %c0_0, %c0_1] : memref<1x8x64xbf16, #tpu.memory_space<vmem>>, vector<1x8x64xbf16>
    %1 = vector.shape_cast %0 : vector<1x8x64xbf16> to vector<8x64xbf16>
    %2 = arith.extf %1 : vector<8x64xbf16> to vector<8x64xf32>
    %c0_2 = arith.constant 0 : index
    %c0_3 = arith.constant 0 : index
    %3 = vector.load %arg2[%c0_2, %c0_3] : memref<8x1xf32, #tpu.memory_space<vmem>>, vector<8x1xf32>
    %4 = vector.broadcast %3 : vector<8x1xf32> to vector<8x64xf32>
    %5 = arith.mulf %2, %4 : vector<8x64xf32>
    %c0_4 = arith.constant 0 : index
    %c0_5 = arith.constant 0 : index
    %6 = vector.load %arg3[%c0_4, %c0_5] : memref<8x1xf32, #tpu.memory_space<vmem>>, vector<8x1xf32>
    %7 = vector.broadcast %6 : vector<8x1xf32> to vector<8x64xf32>
    %8 = arith.addf %5, %7 : vector<8x64xf32>
    %cst = arith.constant 2.000000e-01 : f32
    %9 = vector.broadcast %cst : f32 to vector<8x64xf32>
    %10 = arith.mulf %9, %8 : vector<8x64xf32>
    %11 = arith.maximumf %8, %10 : vector<8x64xf32>
    %c0_6 = arith.constant 0 : index
    %c0_7 = arith.constant 0 : index
    %c0_8 = arith.constant 0 : index
    %12 = vector.load %arg4[%c0_6, %c0_7, %c0_8] : memref<1x8x64xf32, #tpu.memory_space<vmem>>, vector<1x8x64xf32>
    %13 = vector.shape_cast %12 : vector<1x8x64xf32> to vector<8x64xf32>
    %14 = vector.shape_cast %11 : vector<8x64xf32> to vector<1x8x64xf32>
    tpu.vector_store %arg4[%c0_6, %c0_7, %c0_8], %14 {strides = array<i32>} : memref<1x8x64xf32, #tpu.memory_space<vmem>>, vector<1x8x64xf32>,
    return
  }
  func.func @transform_0(%arg0: i32) -> (i32, i32, i32) {
    %c0_i32 = arith.constant 0 : i32
    %c0_i32_0 = arith.constant 0 : i32
    %c0_i32_1 = arith.constant 0 : i32
    return %arg0, %c0_i32, %c0_i32_0 : i32, i32, i32
  }
  func.func @transform_1(%arg0: i32) -> (i32, i32) {
    %c0_i32 = arith.constant 0 : i32
    %c0_i32_0 = arith.constant 0 : i32
    %c0_i32_1 = arith.constant 0 : i32
    return %c0_i32, %c0_i32_0 : i32, i32
  }
  func.func @transform_2(%arg0: i32) -> (i32, i32) {
    %c0_i32 = arith.constant 0 : i32
    %c0_i32_0 = arith.constant 0 : i32
    %c0_i32_1 = arith.constant 0 : i32
    return %c0_i32, %c0_i32_0 : i32, i32
  }
  func.func @transform_3(%arg0: i32) -> (i32, i32, i32) {
    %c0_i32 = arith.constant 0 : i32
    %c0_i32_0 = arith.constant 0 : i32
    %c0_i32_1 = arith.constant 0 : i32
    return %arg0, %c0_i32, %c0_i32_0 : i32, i32, i32
  }
}

</mosaic_0001>

<bundles_post_ra>
// kernel: downsample_conv.3
= control target key start
LH: loop header
LB: loop body
LE: loop exit
PB: predicated region body
PF: predicated region fallthrough
CT: control target
= control target key end

     0   :  { %s287_s12 = smov 0   ;;  %s310_s0 = inlined_call_operand.vmem [shape: bf16[2,8,64], index: 0, kind: input, shape index: {}]   ;;  %s311_s1 = inlined_call_operand.vmem [shape: f32[8,1], index: 1, kind: input, shape index: {}]   ;;  %s312_s2 = inlined_call_operand.vmem [shape: f32[8,1], index: 2, kind: input, shape index: {}]   ;;  %s313_s3 = inlined_call_operand.vmem [shape: f32[2,8,64], index: 3, kind: output, shape index: {}]  }
   0x1 LB: > { %s239_s13 = sadd.s32 4294967295, %s264_s12   ;;  %p243_p0 = scmp.ge.s32.totalorder %s264_s12, 1  ;;  %s264_s12 = sphi %s287_s12, %s13_s12  }
   0x2   : > { %p136_p1 = scmp.lt.s32.totalorder %s264_s12, 3 }
   0x4   : > { %p137_p2 = pnand %p243_p0, %p136_p1 }
   0x5   : > { %v168_v0 = vld [vmem:[%s311_s1] sm:$0xff] (!%p137_p2)  ;;  %v266_v1 = vmov (!%p137_p2), 0   ;;  %p158_p3 = scmp.lt.s32.totalorder (!%p137_p2), %s239_s13, 1  ;;  %vm184_vm0 = vcmask (!%p137_p2), 523264  }
   0x6   : > { %140 = sbr.rel (%p137_p2) target bundleno = 146 (0x92), region = 32  ;;  %257 = vset.pattern.permute.xlu0 (!%p137_p2), %v266_v1  ;;  %v175_v2 = vld [vmem:[%s312_s2] sm:$0xff] (!%p137_p2) }
   0x7   : > { %171 = vperm.xlu0 (!%p137_p2), %257, %v168_v0  }
   0xb   : > { %178 = vperm.xlu0 (!%p137_p2), %257, %v175_v2  }
   0xd   : > { %s315_s13 = smov (!%p158_p3, %s239_s13), 1 }
   0xe   : > { %s244_s18 = sshll.u32 %s315_s13, 2  ;;  %s245_s22 = sshll.u32 %s315_s13, 3 }
   0xf   : > { %s161_s21 = scalar_lea.vmem %s310_s0, %s244_s18  ;;  %s165_s25 = scalar_lea.vmem %s313_s3, %s245_s22 }
  0x10   : > { %v166_v3 = vld [vmem:[%s161_s21] sm:$0xf] }
  0x11   : > { %v167_v4 = vunpack.c.l.bf16 %v166_v3 }
  0x86   : > { %v172_v5 = vpop.permute.xlu0 %171 }
  0x87   : > { %v174_v6 = vmul.f32 %v172_v5, %v167_v4 }
  0x8a   : > { %v179_v7 = vpop.permute.xlu0 %178 }
  0x8b   : > { %v181_v8 = vadd.f32 %v179_v7, %v174_v6 }
  0x8d   : > { %v182_v9 = vmul.f32 0.2, %v181_v8 }
  0x8f   : > { %v183_v10 = vmax.f32 %v181_v8, %v182_v9 }
  0x91   : > { %185 = vst.msk [vmem:[%s165_s25] sm:$0xff] %vm184_vm0, %v183_v10 }
  0x92 PF: > { %s13_s12 = sadd.s32 1, %s264_s12  }
  0x93   : > { %p10_p4 = scmp.ge.s32.totalorder %s13_s12, 4  }
  0x95   :  { %12 = sbr.rel (!%p10_p4) target bundleno = 1 (0x1), region = 62 }

// kernel: downsample_conv.2
= control target key start
LH: loop header
LB: loop body
LE: loop exit
PB: predicated region body
PF: predicated region fallthrough
CT: control target
= control target key end

     0   :  { %s1099_s18 = smov 0   ;;  %s1197_s0 = inlined_call_operand.vmem [shape: bf16[2,9,8,16], index: 0, kind: input, shape index: {}]   ;;  %s1198_s1 = inlined_call_operand.vmem [shape: bf16[2,9,8,16], index: 1, kind: input, shape index: {}]   ;;  %s1199_s2 = inlined_call_operand.vmem [shape: bf16[4,16,8], index: 2, kind: input, shape index: {}]   ;;  %s1200_s3 = inlined_call_operand.vmem [shape: bf16[2,8,64], index: 3, kind: output, shape index: {0}]   ;;  %s1201_s4 = inlined_call_operand.vmem [shape: f32[2,1,8], index: 4, kind: output, shape index: {1}]   ;;  %s1202_s5 = inlined_call_operand.vmem [shape: f32[2,1,8], index: 5, kind: output, shape index: {2}]  }
   0x1 LB: > { %s895_s19 = sadd.s32 4294967295, %s1067_s18   ;;  %p899_p0 = scmp.ge.s32.totalorder %s1067_s18, 1  ;;  %s1067_s18 = sphi %s1099_s18, %s16_s18  }
   0x2   : > { %p202_p1 = scmp.lt.s32.totalorder %s1067_s18, 3 }
   0x4   : > { %p203_p2 = pnand %p899_p0, %p202_p1 }
   0x5   : > { %v1041_v0 = vld [vmem:[%s1199_s2 + $0x8] sm:$0xff] (!%p203_p2)   ;;  %p240_p3 = scmp.lt.s32.totalorder (!%p203_p2), %s895_s19, 1  ;;  %v1042_v1 = vld [vmem:[%s1199_s2 + $0x10] sm:$0xff] (!%p203_p2)   ;;  %v1047_v2 = vld [vmem:[%s1199_s2] sm:$0xff] (!%p203_p2)   ;;  %vm310_vm0 = vcmask (!%p203_p2), 130048   ;;  %vm691_vm1 = vcmask (!%p203_p2), 64512  }
   0x6   : > { %206 = sbr.rel (%p203_p2) target bundleno = 386 (0x182), region = 32  ;;  %967 = vmatprep.subr.bf16.mxu1 (!%p203_p2), %v1041_v0  ;;  %987 = vmatprep.subr.bf16.mxu0 (!%p203_p2), %v1042_v1  ;;  %v1052_v3 = vld [vmem:[%s1199_s2 + $0x18] sm:$0xff] (!%p203_p2)   ;;  %vm713_vm2 = vcmask (!%p203_p2), 57344   ;;  %vm778_vm3 = vcmask (!%p203_p2), 519168  }
   0x7   : > { %968 = vmatpush3.bf16.msra.mxu1 (!%p203_p2), %v1041_v0  ;;  %988 = vmatpush3.bf16.msra.mxu0 (!%p203_p2), %v1042_v1 }
   0x8   : > { %977 = vmatprep.subr.bf16.mxu1 (!%p203_p2), %v1047_v2  ;;  %997 = vmatprep.subr.bf16.mxu0 (!%p203_p2), %v1052_v3 }
   0xd   : > { %s1204_s19 = smov (!%p240_p3, %s895_s19), 1 }
   0xe   : > { %s1031_s28 = smul.u32 36, %s1204_s19  ;;  %s256_s12 = scalar_lea.vmem %s1201_s4, %s1204_s19 }
   0xf   : > { %s259_s15 = scalar_lea.vmem %s1202_s5, %s1204_s19  ;;  %s902_s16 = sshll.u32 %s1204_s19, 2 }
  0x10   : > { %s1125_s6 = scalar_lea.vmem %s1198_s1, %s1031_s28  ;;  %s1130_s9 = scalar_lea.vmem %s1197_s0, %s1031_s28 }
  0x11   : > { %v270_v4 = vld [vmem:[%s1125_s6] sm:$0xf]  ;;  %v271_v5 = vld [vmem:[%s1125_s6 + $0x4] sm:$0xf]  ;;  %v272_v6 = vld [vmem:[%s1125_s6 + $0x8] sm:$0xf]  ;;  %s253_s21 = scalar_lea.vmem %s1200_s3, %s902_s16 }
  0x12   : > { %v273_v7 = vld [vmem:[%s1125_s6 + $0xc] sm:$0xf]  ;;  %v274_v8 = vld [vmem:[%s1125_s6 + $0x10] sm:$0xf]  ;;  %v905_v9 = vcombine.low %v270_v4, %v271_v5  ;;  %v262_v11 = vld [vmem:[%s1130_s9 + $0x4] sm:$0xf]  ;;  %v936_v30 = vcombine.low %v271_v5, %v272_v6 }
  0x13   : > { %v906_v10 = vcombine.low %v272_v6, %v273_v7  ;;  %v263_v12 = vld [vmem:[%s1130_s9 + $0x8] sm:$0xf]  ;;  %v264_v13 = vld [vmem:[%s1130_s9 + $0xc] sm:$0xf]  ;;  %v265_v14 = vld [vmem:[%s1130_s9 + $0x10] sm:$0xf]  ;;  %v937_v33 = vcombine.low %v273_v7, %v274_v8 }
  0x14   : > { %969 = vmatprep.mubr.msk.bf16.mxu1 %vm310_vm0, %v905_v9  ;;  %v925_v15 = vcombine.low %v262_v11, %v263_v12  ;;  %v275_v16 = vld [vmem:[%s1125_s6 + $0x14] sm:$0xf]  ;;  %v926_v18 = vcombine.low %v264_v13, %v265_v14  ;;  %v267_v20 = vld [vmem:[%s1130_s9 + $0x18] sm:$0xf]  ;;  %v277_v23 = vld [vmem:[%s1125_s6 + $0x1c] sm:$0xf]  ;;  %v915_v31 = vcombine.low %v263_v12, %v264_v13 }
  0x15   : > { %v266_v17 = vld [vmem:[%s1130_s9 + $0x14] sm:$0xf]  ;;  %970 = vmatmul.mubr.msk.bf16.vlgmr.msra.gmra.mrb[0].mxu1 %vm310_vm0, %v906_v10  ;;  %v907_v19 = vcombine.low %v274_v8, %v275_v16  ;;  %v276_v22 = vld [vmem:[%s1125_s6 + $0x18] sm:$0xf]  ;;  %v261_v24 = vld [vmem:[%s1130_s9] sm:$0xf] }
  0x16   : > { %989 = vmatprep.mubr.msk.bf16.mxu0 %vm310_vm0, %v925_v15  ;;  %978 = vmatpush3.bf16.msra.mxu1 %v1047_v2  ;;  %v927_v21 = vcombine.low %v266_v17, %v267_v20  ;;  %v268_v25 = vld [vmem:[%s1130_s9 + $0x1c] sm:$0xf]  ;;  %v269_v26 = vld [vmem:[%s1130_s9 + $0x20] sm:$0xf]  ;;  %v908_v27 = vcombine.low %v276_v22, %v277_v23  ;;  %v914_v28 = vcombine.low %v261_v24, %v262_v11 }
  0x17   : > { %990 = vmatmul.mubr.msk.bf16.vlgmr.msra.gmra.mrb[0].mxu0 %vm310_vm0, %v926_v18  ;;  %973 = vmatprep.mubr.msk.bf16.mxu1 %vm310_vm0, %v907_v19  ;;  %v928_v29 = vcombine.low %v268_v25, %v269_v26  ;;  %v916_v32 = vcombine.low %v265_v14, %v266_v17  ;;  %v938_v34 = vcombine.low %v275_v16, %v276_v22  ;;  %v278_v35 = vld [vmem:[%s1125_s6 + $0x20] sm:$0xf] }
  0x18   : > { %998 = vmatpush3.bf16.msra.mxu0 %v1052_v3  ;;  %993 = vmatprep.mubr.msk.bf16.mxu0 %vm310_vm0, %v927_v21  ;;  %v917_v36 = vcombine.low %v267_v20, %v268_v25  ;;  %v939_v37 = vcombine.low %v277_v23, %v278_v35 }
  0x1d   : > { %974 = vmatmul.mubr.msk.bf16.gmra.mrb[4].mxu1 %vm310_vm0, %v908_v27 }
  0x1e   : > { %979 = vmatprep.mubr.msk.bf16.mxu1 %vm310_vm0, %v914_v28 }
  0x1f   : > { %994 = vmatmul.mubr.msk.bf16.gmra.mrb[4].mxu0 %vm310_vm0, %v928_v29 }
  0x20   : > { %999 = vmatprep.mubr.msk.bf16.mxu0 %vm310_vm0, %v936_v30 }
  0x25   : > { %980 = vmatmul.mubr.msk.bf16.vlgmr.msra.gmra.mrb[0].mxu1 %vm310_vm0, %v915_v31 }
  0x26   : > { %983 = vmatprep.mubr.msk.bf16.mxu1 %vm310_vm0, %v916_v32 }
  0x27   : > { %1000 = vmatmul.mubr.msk.bf16.vlgmr.msra.gmra.mrb[0].mxu0 %vm310_vm0, %v937_v33 }
  0x28   : > { %1003 = vmatprep.mubr.msk.bf16.mxu0 %vm310_vm0, %v938_v34 }
  0x2d   : > { %984 = vmatmul.mubr.msk.bf16.gmra.mrb[4].mxu1 %vm310_vm0, %v917_v36 }
  0x2f   : > { %1004 = vmatmul.mubr.msk.bf16.gmra.mrb[4].mxu0 %vm310_vm0, %v939_v37 }
  0xf8   : > { %v981_v38 = vpop.f32.mrb[0].mxu1 }
  0xf9   : > { %v460_v39 = vpop.f32.mrb[1].mxu1 }
  0xfa   : > { %v1001_v40 = vpop.f32.mrb[0].mxu0  ;;  %v982_v41 = vpop.f32.mrb[2].mxu1 }
  0xfb   : > { %v1007_v42 = vadd.f32 %v1001_v40, %v981_v38  ;;  %v652_v43 = vpop.f32.mrb[1].mxu0  ;;  %v463_v44 = vpop.f32.mrb[3].mxu1 }
  0xfc   : > { %v1008_v45 = vadd.f32 %v652_v43, %v460_v39  ;;  %v1002_v46 = vpop.f32.mrb[2].mxu0 }
  0xfd   : > { %v1009_v47 = vadd.f32 %v1002_v46, %v982_v41  ;;  %v655_v48 = vpop.f32.mrb[3].mxu0  ;;  %v717_v51 = vmul.f32 %v1007_v42, %v1007_v42  ;;  %v695_v59 = vsel %vm691_vm1, %v1007_v42, 0.0 }
  0xfe   : > { %v715_v49 = vmul.f32 %v1008_v45, %v1008_v45  ;;  %v1010_v50 = vadd.f32 %v655_v48, %v463_v44  ;;  %745 = vxpose.xlu0.b32.start [1/8] (short) (narrow) %v1008_v45, 8  ;;  %v692_v52 = vsel %vm691_vm1, %v1008_v45, 0.0 }
  0xff   : > { %v718_v56 = vmul.f32 %v1009_v47, %v1009_v47  ;;  %v726_v5 = vsel %vm691_vm1, %v717_v51, 0.0  ;;  %v697_v6 = vsel %vm691_vm1, %v1009_v47, 0.0 }
 0x100   : > { %v693_v53 = vsel %vm691_vm1, %v1010_v50, 0.0  ;;  %v716_v54 = vmul.f32 %v1010_v50, %v1010_v50  ;;  %v985_v55 = vpop.f32.mrb[4].mxu1  ;;  %v723_v60 = vsel %vm691_vm1, %v715_v49, 0.0 }
 0x101   : > { %v694_v57 = vadd.f32 %v693_v53, %v692_v52  ;;  %v476_v58 = vpop.f32.mrb[5].mxu1  ;;  %v728_v9 = vsel %vm691_vm1, %v718_v56, 0.0 }
 0x102   : > { %v724_v61 = vsel %vm691_vm1, %v716_v54, 0.0  ;;  %v1005_v62 = vpop.f32.mrb[4].mxu0  ;;  %746 = vxpose.xlu0.b32.cont [2/8] (short) (narrow) %v1010_v50, 8  ;;  %v986_v63 = vpop.f32.mrb[6].mxu1 }
 0x103   : > { %v696_v0 = vadd.f32 %v695_v59, %v694_v57  ;;  %v725_v1 = vadd.f32 %v724_v61, %v723_v60  ;;  %v1011_v2 = vadd.f32 %v1005_v62, %v985_v55  ;;  %v668_v3 = vpop.f32.mrb[5].mxu0  ;;  %v479_v4 = vpop.f32.mrb[7].mxu1 }
 0x104   : > { %v1012_v7 = vadd.f32 %v668_v3, %v476_v58  ;;  %v1006_v8 = vpop.f32.mrb[6].mxu0 }
 0x105   : > { %v727_v10 = vadd.f32 %v726_v5, %v725_v1  ;;  %v698_v11 = vadd.f32 %v697_v6, %v696_v0  ;;  %v671_v12 = vpop.f32.mrb[7].mxu0  ;;  %v1013_v15 = vadd.f32 %v1006_v8, %v986_v63  ;;  %v721_v21 = vmul.f32 %v1011_v2, %v1011_v2 }
 0x106   : > { %v699_v13 = vsel %vm691_vm1, %v1012_v7, 0.0  ;;  %v719_v14 = vmul.f32 %v1012_v7, %v1012_v7  ;;  %v1014_v16 = vadd.f32 %v671_v12, %v479_v4  ;;  %747 = vxpose.xlu0.b32.cont [3/8] (short) (narrow) %v1007_v42, 8  ;;  %v703_v25 = vsel %vm691_vm1, %v1011_v2, 0.0 }
 0x107   : > { %v700_v17 = vadd.f32 %v699_v13, %v698_v11  ;;  %v729_v18 = vadd.f32 %v728_v9, %v727_v10  ;;  %v722_v26 = vmul.f32 %v1013_v15, %v1013_v15  ;;  %v705_v29 = vsel %vm691_vm1, %v1013_v15, 0.0 }
 0x108   : > { %v730_v19 = vsel %vm691_vm1, %v719_v14, 0.0  ;;  %v701_v20 = vsel %vm691_vm1, %v1014_v16, 0.0  ;;  %v720_v24 = vmul.f32 %v1014_v16, %v1014_v16  ;;  %v734_v31 = vsel %vm691_vm1, %v721_v21, 0.0 }
 0x109   : > { %v731_v22 = vadd.f32 %v730_v19, %v729_v18  ;;  %v702_v23 = vadd.f32 %v701_v20, %v700_v17  ;;  %v736_v34 = vsel %vm691_vm1, %v722_v26, 0.0 }
 0x10a   : > { %748 = vxpose.xlu0.b32.cont [4/8] (short) (narrow) %v1009_v47, 8  ;;  %v732_v28 = vsel %vm691_vm1, %v720_v24, 0.0 }
 0x10b   : > { %v704_v27 = vadd.f32 %v703_v25, %v702_v23  ;;  %v733_v30 = vadd.f32 %v732_v28, %v731_v22 }
 0x10d   : > { %v706_v32 = vadd.f32 %v705_v29, %v704_v27  ;;  %v735_v33 = vadd.f32 %v734_v31, %v733_v30 }
 0x10e   : > { %749 = vxpose.xlu0.b32.cont [5/8] (short) (narrow) %v1012_v7, 8 }
 0x10f   : > { %v707_v35 = vrot.slane %v706_v32, 4  ;;  %v737_v36 = vadd.f32 %v736_v34, %v735_v33 }
 0x111   : > { %v708_v37 = vadd.f32 %v707_v35, %v706_v32  ;;  %v738_v38 = vrot.slane %v737_v36, 4 }
 0x112   : > { %750 = vxpose.xlu0.b32.cont [6/8] (short) (narrow) %v1014_v16, 8 }
 0x113   : > { %v709_v39 = vrot.slane %v708_v37, 2  ;;  %v739_v40 = vadd.f32 %v738_v38, %v737_v36 }
 0x115   : > { %v710_v41 = vadd.f32 %v709_v39, %v708_v37  ;;  %v740_v42 = vrot.slane %v739_v40, 2 }
 0x116   : > { %751 = vxpose.xlu0.b32.cont [7/8] (short) (narrow) %v1011_v2, 8 }
 0x117   : > { %v711_v43 = vrot.slane %v710_v41, 1  ;;  %v741_v44 = vadd.f32 %v740_v42, %v739_v40 }
 0x119   : > { %v712_v45 = vadd.f32 %v711_v43, %v710_v41  ;;  %v742_v46 = vrot.slane %v741_v44, 1 }
 0x11a   : > { %752 = vxpose.xlu0.b32.end [8/8] (short) (narrow) %v1013_v15, 8 }
 0x11b   : > { %714 = vst.msk [vmem:[%s256_s12] sm:$0x1] %vm713_vm2, %v712_v45  ;;  %v743_v47 = vadd.f32 %v742_v46, %v741_v44 }
 0x11d   : > { %744 = vst.msk [vmem:[%s259_s15] sm:$0x1] %vm713_vm2, %v743_v47 }
 0x17e   : > { %v761_v48 = vpop.trf.xlu0 }
 0x17f   : > { %v777_v49 = vpack.c.bf16 %v761_v48, %v761_v48 }
 0x181   : > { %779 = vst.msk [vmem:[%s253_s21] sm:$0xf] %vm778_vm3, %v777_v49 }
 0x182 PF: > { %s16_s18 = sadd.s32 1, %s1067_s18  }
 0x183   : > { %p13_p4 = scmp.ge.s32.totalorder %s16_s18, 4  }
 0x185   :  { %15 = sbr.rel (!%p13_p4) target bundleno = 1 (0x1), region = 92 }

</bundles_post_ra>
